<compile_context>
chip_gen: v7x
topology: tpu7x:2x2x1
jax: 0.10.0
libtpu: 0.0.40
codegen_flags: <defaults>
</compile_context>

<pallas_src>
import jax
import jax.numpy as jnp
import numpy as np
from jax.experimental import pallas as pl
from jax.experimental.pallas import tpu as pltpu


def _round_up(x, m):
    return (x + m - 1) // m * m


def _vmem_capacity_bytes():
    """Chip-aware VMEM capacity; conservative (v7x per-TC) fallback."""
    try:
        return int(pltpu.get_tpu_info().vmem_capacity_bytes)
    except Exception:
        return 64 * 1024 * 1024


# ---------------------------------------------------------------------------
# One-time parameter preparation (hoisted out of the hot path).
# ---------------------------------------------------------------------------
def prepare_mlp_params(w1, b1, w2, b2, compute_dtype=jnp.bfloat16):
    """Fold the two Linear layers into one affine map.

    w1: (in_f, hid), b1: (1, hid), w2: (hid, out_f), b2: (1, out_f)
    (weights stored pre-transposed relative to PyTorch's (out, in) layout).

    Returns (w_fused_bf16 (in_f, out_pad), b_fused_f32 (1, out_pad), out_f).
    """
    w1f = w1.astype(jnp.float32)
    w2f = w2.astype(jnp.float32)
    # Off the hot path -> use HIGHEST precision for the fold itself.
    w = jnp.dot(w1f, w2f, precision=jax.lax.Precision.HIGHEST)          # (in_f, out_f)
    b = (jnp.dot(b1.astype(jnp.float32), w2f,
                 precision=jax.lax.Precision.HIGHEST)
         + b2.astype(jnp.float32))                                      # (1, out_f)

    out_f = int(w.shape[1])
    out_pad = _round_up(out_f, 128)          # lane-dense output columns
    if out_pad != out_f:
        w = jnp.pad(w, ((0, 0), (0, out_pad - out_f)))
        b = jnp.pad(b, ((0, 0), (0, out_pad - out_f)))

    return w.astype(compute_dtype), b, out_f


# ---------------------------------------------------------------------------
# Kernel: tiled matmul + bias with f32 accumulation.
# ---------------------------------------------------------------------------
def matmul_bias_kernel(x_ref, w_ref, b_ref, o_ref, acc_ref):
    @pl.when(pl.program_id(2) == 0)
    def _():
        acc_ref[...] = jnp.zeros_like(acc_ref)

    # bf16 MXU operands (cast x in-kernel on the VPU), f32 accumulation.
    acc_ref[...] += jnp.dot(x_ref[...].astype(w_ref.dtype), w_ref[...],
                            preferred_element_type=jnp.float32)

    @pl.when(pl.program_id(2) == pl.num_programs(2) - 1)
    def _():
        o_ref[...] = (acc_ref[...] + b_ref[...]).astype(o_ref.dtype)


# ---------------------------------------------------------------------------
# Tile selection.
# ---------------------------------------------------------------------------
def _pick_tile_m(B):
    # Prefer >= 2 grid steps along the batch axis (v7x megacore) with
    # MXU/(8,128)-friendly tiles; otherwise take the full batch.
    for t in (512, 256, 128, 64, 32, 16, 8):
        if B % t == 0 and B // t >= 2:
            return t
    return B


def _pick_tile_n(n_pad):
    # n_pad is a multiple of 128.
    for t in (512, 256, 128):
        if n_pad % t == 0:
            return t
    return n_pad


def _pick_tile_k(k_dim):
    if k_dim <= 2048:
        return k_dim             # keep the contraction dim whole when small
    for t in (1024, 512, 256):
        if k_dim % t == 0:
            return t
    return k_dim


# ---------------------------------------------------------------------------
# Forward pass (hot path): a single pallas_call.
# ---------------------------------------------------------------------------
def mlp_forward(x, w_fused, b_fused, out_f):
    """x: (B, in_f) -- returns (B, out_f) in x.dtype."""
    B, in_f = x.shape
    in_f_w, out_pad = w_fused.shape
    assert in_f == in_f_w, "x / fused-weight shape mismatch"

    tm = _pick_tile_m(B)
    tn = _pick_tile_n(out_pad)
    tk = _pick_tile_k(in_f)
    grid = (B // tm, out_pad // tn, pl.cdiv(in_f, tk))

    out_dtype = x.dtype

    # VMEM budget: double-buffered tiles + in-kernel bf16 x copy + f32 acc.
    csz_x = jnp.dtype(x.dtype).itemsize
    csz_w = jnp.dtype(w_fused.dtype).itemsize
    csz_o = jnp.dtype(out_dtype).itemsize
    vmem_needed = (
        2 * tm * tk * csz_x          # x input tiles (double buffered)
        + tm * tk * csz_w            # in-kernel bf16 copy of the x tile
        + 2 * tk * tn * csz_w        # fused-weight tiles
        + 2 * tn * 4                 # bias tiles (f32)
        + 2 * tm * tn * csz_o        # output tiles
        + tm * tn * 4                # f32 accumulator scratch
    )
    vmem_cap = _vmem_capacity_bytes()
    vmem_limit = int(min(max(2 * vmem_needed, 32 * 1024 * 1024),
                         int(0.9 * vmem_cap)))

    out_padded = pl.pallas_call(
        matmul_bias_kernel,
        out_shape=jax.ShapeDtypeStruct((B, out_pad), out_dtype),
        grid=grid,
        in_specs=[
            pl.BlockSpec((tm, tk), lambda i, j, k: (i, k)),   # x
            pl.BlockSpec((tk, tn), lambda i, j, k: (k, j)),   # fused W
            pl.BlockSpec((1, tn),  lambda i, j, k: (0, j)),   # fused bias (f32)
        ],
        out_specs=pl.BlockSpec((tm, tn), lambda i, j, k: (i, j)),
        scratch_shapes=[pltpu.VMEM((tm, tn), jnp.float32)],
        compiler_params=pltpu.CompilerParams(
            dimension_semantics=("parallel", "parallel", "arbitrary"),
            vmem_limit_bytes=vmem_limit,
        ),
    )(x, w_fused, b_fused)

    if out_pad != out_f:
        return out_padded[:, :out_f]   # only when out_f % 128 != 0
    return out_padded


# ---------------------------------------------------------------------------
# PyTorch-style Linear init (weights stored transposed: (in, out)).
# ---------------------------------------------------------------------------
def init_linear_params(key, in_features, out_features, dtype=jnp.float32):
    k_w, k_b = jax.random.split(key)
    bound = 1.0 / np.sqrt(in_features)
    w = jax.random.uniform(k_w, (in_features, out_features), dtype,
                           minval=-bound, maxval=bound)
    b = jax.random.uniform(k_b, (1, out_features), dtype,
                           minval=-bound, maxval=bound)
    return w, b


if __name__ == "__main__":
    # Small shapes consistent with the module (hidden_features default 128).
    batch = 8
    in_features = 32
    hidden_features = 128
    out_features = 16

    key = jax.random.PRNGKey(0)
    k_x, k_l1, k_l2 = jax.random.split(key, 3)

    x = jax.random.normal(k_x, (batch, in_features), jnp.float32)
    w1, b1 = init_linear_params(k_l1, in_features, hidden_features)
    w2, b2 = init_linear_params(k_l2, hidden_features, out_features)

    # One-time parameter prep (fold + pad + cast) -- hoisted off the hot path.
    w_fused, b_fused, out_f = prepare_mlp_params(w1, b1, w2, b2)
    w_fused, b_fused = jax.block_until_ready((w_fused, b_fused))

    out = mlp_forward(x, w_fused, b_fused, out_f)
    out = jax.block_until_ready(out)

    # Reference: the original two-layer forward, exact (float64 on host).
    xn = np.asarray(x, dtype=np.float64)
    ref = (xn @ np.asarray(w1, np.float64) + np.asarray(b1, np.float64)) \
        @ np.asarray(w2, np.float64) + np.asarray(b2, np.float64)

    assert out.shape == (batch, out_features) and out.dtype == x.dtype
    np.testing.assert_allclose(np.asarray(out, np.float64), ref,
                               rtol=3e-2, atol=3e-2)

    print("KERNEL_OK")
</pallas_src>

<mosaic_0001>
module attributes {stable_mosaic.version = 11 : i64} {
  func.func @matmul_bias_kernel(%arg0: i32, %arg1: i32, %arg2: i32, %arg3: memref<8x32xf32, #tpu.memory_space<vmem>>, %arg4: memref<32x128xbf16, #tpu.memory_space<vmem>>, %arg5: memref<1x128xf32, #tpu.memory_space<vmem>>, %arg6: memref<8x128xf32, #tpu.memory_space<vmem>>, %arg7: memref<8x128xf32, #tpu.memory_space<vmem>>) attributes {dimension_semantics = [#tpu.dimension_semantics<parallel>, #tpu.dimension_semantics<parallel>, #tpu.dimension_semantics<arbitrary>], iteration_bounds = array<i64: 1, 1, 1>, scalar_prefetch = 0 : i64, scratch_operands = 1 : i64, tpu.core_type = #tpu.core_type<tc>, window_params = [{transform_indices = @transform_0, window_bounds = array<i64: 8, 32>}, {transform_indices = @transform_1, window_bounds = array<i64: 32, 128>}, {transform_indices = @transform_2, window_bounds = array<i64: 1, 128>}, {transform_indices = @transform_3, window_bounds = array<i64: 8, 128>}]} {
    %c0_i32 = arith.constant 0 : i32
    %0 = arith.cmpi eq, %arg2, %c0_i32 : i32
    %1 = arith.extui %0 : i1 to i32
    %c0_i32_0 = arith.constant 0 : i32
    %2 = arith.cmpi ne, %1, %c0_i32_0 : i32
    scf.if %2 {
      %cst_10 = arith.constant 0.000000e+00 : f32
      %13 = vector.broadcast %cst_10 : f32 to vector<8x128xf32>
      %c0_11 = arith.constant 0 : index
      %c0_12 = arith.constant 0 : index
      %14 = vector.load %arg7[%c0_11, %c0_12] : memref<8x128xf32, #tpu.memory_space<vmem>>, vector<8x128xf32>
      tpu.vector_store %arg7[%c0_11, %c0_12], %13 {strides = array<i32>} : memref<8x128xf32, #tpu.memory_space<vmem>>, vector<8x128xf32>,
    } else {
    }
    %c0 = arith.constant 0 : index
    %c0_1 = arith.constant 0 : index
    %3 = vector.load %arg7[%c0, %c0_1] : memref<8x128xf32, #tpu.memory_space<vmem>>, vector<8x128xf32>
    %c0_2 = arith.constant 0 : index
    %c0_3 = arith.constant 0 : index
    %4 = vector.load %arg3[%c0_2, %c0_3] : memref<8x32xf32, #tpu.memory_space<vmem>>, vector<8x32xf32>
    %5 = arith.truncf %4 : vector<8x32xf32> to vector<8x32xbf16>
    %c0_4 = arith.constant 0 : index
    %c0_5 = arith.constant 0 : index
    %6 = vector.load %arg4[%c0_4, %c0_5] : memref<32x128xbf16, #tpu.memory_space<vmem>>, vector<32x128xbf16>
    %cst = arith.constant dense<0.000000e+00> : vector<8x128xf32>
    %7 = tpu.matmul %5, %6, %cst {dimension_numbers = #tpu.dot_dimension_numbers<[1], [0], [0], [1], [0, 0, 1, 1], [], []>} : vector<8x32xbf16>, vector<32x128xbf16>, vector<8x128xf32> -> vector<8x128xf32>
    %8 = arith.addf %3, %7 : vector<8x128xf32>
    %c0_6 = arith.constant 0 : index
    %c0_7 = arith.constant 0 : index
    %9 = vector.load %arg7[%c0_6, %c0_7] : memref<8x128xf32, #tpu.memory_space<vmem>>, vector<8x128xf32>
    tpu.vector_store %arg7[%c0_6, %c0_7], %8 {strides = array<i32>} : memref<8x128xf32, #tpu.memory_space<vmem>>, vector<8x128xf32>,
    %c0_i32_8 = arith.constant 0 : i32
    %10 = arith.cmpi eq, %arg2, %c0_i32_8 : i32
    %11 = arith.extui %10 : i1 to i32
    %c0_i32_9 = arith.constant 0 : i32
    %12 = arith.cmpi ne, %11, %c0_i32_9 : i32
    scf.if %12 {
      %c0_10 = arith.constant 0 : index
      %c0_11 = arith.constant 0 : index
      %13 = vector.load %arg7[%c0_10, %c0_11] : memref<8x128xf32, #tpu.memory_space<vmem>>, vector<8x128xf32>
      %c0_12 = arith.constant 0 : index
      %c0_13 = arith.constant 0 : index
      %14 = vector.load %arg5[%c0_12, %c0_13] : memref<1x128xf32, #tpu.memory_space<vmem>>, vector<1x128xf32>
      %15 = vector.broadcast %14 : vector<1x128xf32> to vector<8x128xf32>
      %16 = arith.addf %13, %15 : vector<8x128xf32>
      %c0_14 = arith.constant 0 : index
      %c0_15 = arith.constant 0 : index
      %17 = vector.load %arg6[%c0_14, %c0_15] : memref<8x128xf32, #tpu.memory_space<vmem>>, vector<8x128xf32>
      tpu.vector_store %arg6[%c0_14, %c0_15], %16 {strides = array<i32>} : memref<8x128xf32, #tpu.memory_space<vmem>>, vector<8x128xf32>,
    } else {
    }
    return
  }
  func.func @transform_0(%arg0: i32, %arg1: i32, %arg2: i32) -> (i32, i32) {
    %c0_i32 = arith.constant 0 : i32
    return %arg0, %arg2 : i32, i32
  }
  func.func @transform_1(%arg0: i32, %arg1: i32, %arg2: i32) -> (i32, i32) {
    %c0_i32 = arith.constant 0 : i32
    return %arg2, %arg1 : i32, i32
  }
  func.func @transform_2(%arg0: i32, %arg1: i32, %arg2: i32) -> (i32, i32) {
    %c0_i32 = arith.constant 0 : i32
    %c0_i32_0 = arith.constant 0 : i32
    return %c0_i32, %arg1 : i32, i32
  }
  func.func @transform_3(%arg0: i32, %arg1: i32, %arg2: i32) -> (i32, i32) {
    %c0_i32 = arith.constant 0 : i32
    return %arg0, %arg1 : i32, i32
  }
}

</mosaic_0001>

<bundles_post_ra>
// kernel: tpu_custom_call.1
= control target key start
LH: loop header
LB: loop body
LE: loop exit
PB: predicated region body
PF: predicated region fallthrough
CT: control target
= control target key end

     0   :  { %8 = vsyncpa [#allocation4], 0  ;;  %s310_s0 = inlined_call_operand.hbm [shape: f32[8,32], index: 0, kind: input, shape index: {}]   ;;  %s311_s1 = inlined_call_operand.hbm [shape: bf16[32,128], index: 1, kind: input, shape index: {}]   ;;  %s312_s2 = inlined_call_operand.vmem [shape: f32[1,128], index: 2, kind: input, shape index: {}]   ;;  %s313_s3 = inlined_call_operand.hbm [shape: f32[8,128], index: 3, kind: output, shape index: {}]  }
   0x1   :  { %9 = vsyncpa [#allocation7], 0 }
   0x2   :  { %10 = vsyncpa [#allocation5], 0  ;;  %s237_s12 = smov [#allocation3]   ;;  %s238_s14 = smov [#allocation6]  }
   0x3   :  { %s17_s13 = sshll.u32 %s237_s12, 4  ;;  %s26_s15 = sshll.u32 %s238_s14, 4  ;;  %s18_s13 = int_to_ptr.vmem [resolvable:$true] %s17_s13  ;;  %s264_s15 = int_to_ptr.vmem [resolvable:$true] %s26_s15 }
   0x4   :  { %s165_s18 = scalar_lea.hbm %s310_s0, 128 }
   0x5   :  { %p166_p0 = scmp.ne.s32.totalorder %s310_s0, %s165_s18  ;;  %p169_p1 = scmp.lt.u32.totalorder %s165_s18, %s310_s0 }
   0x7   :  { %p171_p2 = pnand %p169_p1, %p166_p0 }
   0x9   :  { %174 = shalt.err (!%p171_p2)
}
   0xa   :  { %s175_s23 = scalar_lea.vmem %s18_s13, 128  ;;  %p180_p4 = scmp.lt.s32.totalorder %s18_s13, %s18_s13 }
   0xb   :  { %p176_p3 = scmp.ne.s32.totalorder %s18_s13, %s175_s23  ;;  %p181_p5 = scmp.lt.s32.totalorder %s175_s23, %s175_s23 }
   0xd   :  { %p182_p6 = por %p181_p5, %p180_p4 }
   0xf   :  { %p183_p7 = pnand %p182_p6, %p176_p3 }
  0x11   :  { %186 = shalt.err (!%p183_p7)
}
  0x12   :  { %20 = dma.hbm_to_vmem [thread:$0]  %s310_s0, 128, %s18_s13, [#allocation4]  }
  0x13   :  { %s187_s28 = scalar_lea.hbm %s311_s1, 256 }
  0x14   :  { %p188_p8 = scmp.ne.s32.totalorder %s311_s1, %s187_s28  ;;  %p191_p9 = scmp.lt.u32.totalorder %s187_s28, %s311_s1 }
  0x16   :  { %p193_p10 = pnand %p191_p9, %p188_p8 }
  0x18   :  { %196 = shalt.err (!%p193_p10)
}
  0x19   :  { %s197_s6 = scalar_lea.vmem %s264_s15, 256  ;;  %p202_p12 = scmp.lt.s32.totalorder %s264_s15, %s264_s15 }
  0x1a   :  { %p198_p11 = scmp.ne.s32.totalorder %s264_s15, %s197_s6  ;;  %p203_p13 = scmp.lt.s32.totalorder %s197_s6, %s197_s6 }
  0x1c   :  { %p204_p0 = por %p203_p13, %p202_p12 }
  0x1e   :  { %p205_p1 = pnand %p204_p0, %p198_p11 }
  0x20   :  { %208 = shalt.err (!%p205_p1)
}
  0x21   :  { %s239_s0 = smov 64   ;;  %s240_s7 = smov 4  }
  0x22   :  { %32 = dma.hbm_to_vmem [thread:$0]  %s311_s1, 256, %s264_s15, [#allocation7], %s239_s0, %s239_s0, %s240_s7  }
  0x23   :  { %231 = dma.done.wait [#allocation4], 128  }
  0x24   :  { %232 = vsyncadd [#allocation4], 4294967168 }
  0x25   :  { %233 = dma.done.wait [#allocation7], 256  }
  0x26   :  { %234 = vsyncadd [#allocation7], 4294967040  ;;  %v241_v0 = vmov 0.0   ;;  %vm242_vm0 = vmmov 0   ;;  %v163_v1 = vld [vmem:[#allocation6] sm:$0xff]   ;;  %v164_v2 = vld [vmem:[#allocation6 + $0x8] sm:$0xff]  }
  0x27   :  { %148 = vmatprep.subr.bf16.mxu0 %v241_v0  ;;  %152 = vmatprep.mubr.msk.bf16.mxu0 %vm242_vm0, %v241_v0  ;;  %v48_v3 = vld [vmem:[#allocation3] sm:$0xff]  ;;  %vm66_vm1 = vcmask 261120   ;;  %s243_s1 = smov [#allocation8]  }
  0x28   :  { %149 = vmatpush3.bf16.msra.mxu0 %v163_v1  ;;  %v49_v4 = vpack.c.bf16 %v48_v3, %v48_v3  ;;  %v144_v5 = vld [vmem:[%s312_s2] ss:$0 sm:$0xff]  ;;  %s131_s12 = sshll.u32 %s243_s1, 4  ;;  %s132_s12 = int_to_ptr.vmem [resolvable:$true] %s131_s12 }
  0x29   :  { %150 = vmatprep.subr.bf16.mxu0 %v241_v0  ;;  %s209_s13 = scalar_lea.vmem %s132_s12, 128  ;;  %p214_p3 = scmp.lt.s32.totalorder %s132_s12, %s132_s12 }
  0x2a   :  { %p210_p2 = scmp.ne.s32.totalorder %s132_s12, %s209_s13  ;;  %p215_p4 = scmp.lt.s32.totalorder %s209_s13, %s209_s13 }
  0x2c   :  { %151 = vmatpush3.bf16.msra.mxu0 %v164_v2  ;;  %p216_p5 = por %p215_p4, %p214_p3 }
  0x2e   :  { %p217_p6 = pnand %p216_p5, %p210_p2 }
  0x2f   :  { %153 = vmatmul.mubr.msk.bf16.vlgmr.msra.gmra.mrb[0].mxu0 %vm66_vm1, %v49_v4 }
 0x102   :  { %v104_v6 = vpop.f32.mrb[0].mxu0 }
 0x103   :  { %v123_v7 = vadd.f32 %v144_v5, %v104_v6  ;;  %v154_v8 = vpop.f32.mrb[1].mxu0 }
 0x104   :  { %v107_v9 = vpop.f32.mrb[2].mxu0 }
 0x105   :  { %124 = vst [vmem:[#allocation8] sm:$0xff] %v123_v7  ;;  %v155_v10 = vpop.f32.mrb[3].mxu0 }
 0x106   :  { %220 = shalt.err (!%p217_p6)
}
 0x107   :  { %s221_s2 = scalar_lea.hbm %s313_s3, 128 }
 0x108   :  { %p222_p7 = scmp.ne.s32.totalorder %s313_s3, %s221_s2  ;;  %p225_p8 = scmp.lt.u32.totalorder %s221_s2, %s313_s3 }
 0x10a   :  { %p227_p9 = pnand %p225_p8, %p222_p7 }
 0x10c   :  { %230 = shalt.err (!%p227_p9)
}
 0x10d   :  { %134 = dma.vmem_to_hbm [thread:$0]  %s132_s12, 128, %s313_s3, [#allocation5]  }
 0x10e   :  { %235 = dma.done.wait [#allocation5], 128  }
 0x10f   :  { %236 = vsyncadd [#allocation5], 4294967168 }
 0x110   :  { %138 = vsyncpa [#allocation4], 1 }
 0x111   :  { %139 = vsyncpa [#allocation7], 1 }
 0x112   :  { %140 = vsyncpa [#allocation5], 1 }

</bundles_post_ra>
